<compile_context>
chip_gen: v6e
topology: v6e:2x2x1
jax: 0.10.0
libtpu: 0.0.40
codegen_flags: <defaults>
</compile_context>

<pallas_src>
import functools
import math

import jax
import jax.numpy as jnp
from jax.experimental import pallas as pl
from jax.experimental.pallas import tpu as pltpu


# ---------------------------------------------------------------------------
# helpers
# ---------------------------------------------------------------------------
def _round_up(x, m):
    return ((x + m - 1) // m) * m


def _pick_tile(dim, preferred):
    """Largest multiple-of-128 divisor of `dim` that is <= preferred, else full dim."""
    if dim <= preferred:
        return dim
    t = (preferred // 128) * 128
    while t >= 128:
        if dim % t == 0:
            return t
        t -= 128
    return dim  # only reachable for non-128-granular dims (attention S fallback)


def _vmem_limit(block_bytes, scratch_bytes, headroom=16 * 1024 * 1024):
    # double-buffered pipeline slots for every block + persistent scratch + headroom
    # (headroom covers compiler temporaries such as the per-head s/p tiles).
    return int(2 * block_bytes + scratch_bytes + headroom)


# ---------------------------------------------------------------------------
# Tiled linear:  y = x @ W^T + b   (PyTorch nn.Linear semantics, W is (out, in))
# bf16 operands, f32 VMEM accumulator, init/finalize on the K axis via pl.when.
# ---------------------------------------------------------------------------
def _matmul_bias_kernel(x_ref, w_ref, b_ref, o_ref, acc_ref):
    k = pl.program_id(2)

    @pl.when(k == 0)
    def _():
        acc_ref[...] = jnp.zeros_like(acc_ref)

    # Contract the E_in axes directly (x:(tm,tk) with w:(tn,tk)) -> no .T materialized.
    acc_ref[...] += jax.lax.dot_general(
        x_ref[...], w_ref[...],
        dimension_numbers=(((1,), (1,)), ((), ())),
        preferred_element_type=jnp.float32)

    @pl.when(k == pl.num_programs(2) - 1)
    def _():
        o_ref[...] = (acc_ref[...] + b_ref[...].astype(jnp.float32)).astype(o_ref.dtype)


def pallas_linear(x2d, w, b, *, tm=512, tn=512, tk=256, out_dtype=None):
    """x2d: (M, K) activations, w: (N, K) PyTorch-layout weight, b: (N,)."""
    M, K = x2d.shape
    N, Kw = w.shape
    assert K == Kw
    out_dtype = jnp.dtype(out_dtype) if out_dtype is not None else x2d.dtype

    # Pad to 128-granular shapes so tiles stay bounded (no full-extent fallback).
    Mp, Np, Kp = _round_up(M, 128), _round_up(N, 128), _round_up(K, 128)
    if (Mp, Kp) != (M, K):
        x2d = jnp.pad(x2d, ((0, Mp - M), (0, Kp - K)))
    if (Np, Kp) != (N, K):
        w = jnp.pad(w, ((0, Np - N), (0, Kp - K)))
    if Np != N:
        b = jnp.pad(b, (0, Np - N))

    tm, tn, tk = _pick_tile(Mp, tm), _pick_tile(Np, tn), _pick_tile(Kp, tk)
    b2 = b.reshape(1, Np)
    grid = (Mp // tm, Np // tn, Kp // tk)

    isz = x2d.dtype.itemsize
    wsz = w.dtype.itemsize
    osz = jnp.dtype(out_dtype).itemsize
    block_bytes = (tm * tk * isz + tn * tk * wsz + tn * b2.dtype.itemsize + tm * tn * osz)
    scratch_bytes = tm * tn * 4

    out = pl.pallas_call(
        _matmul_bias_kernel,
        out_shape=jax.ShapeDtypeStruct((Mp, Np), out_dtype),
        grid_spec=pltpu.PrefetchScalarGridSpec(
            num_scalar_prefetch=0,
            grid=grid,
            in_specs=[
                pl.BlockSpec((tm, tk), lambda i, j, k: (i, k)),
                pl.BlockSpec((tn, tk), lambda i, j, k: (j, k)),
                pl.BlockSpec((1, tn), lambda i, j, k: (0, j)),
            ],
            out_specs=pl.BlockSpec((tm, tn), lambda i, j, k: (i, j)),
            scratch_shapes=[pltpu.VMEM((tm, tn), jnp.float32)],
        ),
        compiler_params=pltpu.CompilerParams(
            dimension_semantics=("parallel", "parallel", "arbitrary"),
            vmem_limit_bytes=_vmem_limit(block_bytes, scratch_bytes)),
        cost_estimate=pl.CostEstimate(
            flops=2 * Mp * Np * Kp,
            transcendentals=0,
            bytes_accessed=Mp * Kp * isz + Np * Kp * wsz + Mp * Np * osz),
    )(x2d, w, b2)

    if (Mp, Np) != (M, N):
        out = out[:M, :N]
    return out


# ---------------------------------------------------------------------------
# Flash-style attention, heads packed along the last (lane) dim.
#   q/k/v blocks: (1, tile, E) column-slices of (B, S, E) (or of fused (B, S, 3E))
#   grid: (B, Sq//tq, Skv//tkv), kv axis is the online-softmax reduction.
#   acc scratch is a single lane-dense (tq, E) f32 buffer: one full-width
#   alpha-rescale per kv step and one (tq, E) store at finalize (no concat of
#   padded per-head accumulators).
# ---------------------------------------------------------------------------
def _flash_attn_kernel(mask_ref, q_ref, k_ref, v_ref, o_ref,
                       m_sc, l_sc, acc_sc, *, num_heads):
    ki = pl.program_id(2)

    @pl.when(ki == 0)
    def _():
        m_sc[...] = jnp.full_like(m_sc, -jnp.inf)
        l_sc[...] = jnp.zeros_like(l_sc)
        acc_sc[...] = jnp.zeros_like(acc_sc)

    q_blk = q_ref[0]                   # (tq, E) bf16 -- already scaled by 1/sqrt(d_k)
    k_blk = k_ref[0]                   # (tkv, E) bf16
    v_blk = v_ref[0]                   # (tkv, E) bf16
    masked_out = mask_ref[0] == 0      # (tq, tkv) from int8 mask
    neg_big = jnp.float32(-1e9)        # keep -1e9 (NOT -inf): matches reference, no NaNs

    tq, E = q_blk.shape
    d_k = E // num_heads

    m_prev_all = m_sc[...]             # (tq, H) f32
    l_prev_all = l_sc[...]             # (tq, H) f32

    m_new_l, l_new_l, alpha_l, pv_l = [], [], [], []
    for h in range(num_heads):         # static unroll over heads
        cols = slice(h * d_k, (h + 1) * d_k)
        q_h = q_blk[:, cols]           # (tq, d_k) bf16
        k_h = k_blk[:, cols]           # (tkv, d_k) bf16
        v_h = v_blk[:, cols]           # (tkv, d_k) bf16

        # scores = q_h @ k_h^T on the MXU in bf16, f32 accumulation
        s = jax.lax.dot_general(
            q_h, k_h, dimension_numbers=(((1,), (1,)), ((), ())),
            preferred_element_type=jnp.float32)                      # (tq, tkv) f32
        s = jnp.where(masked_out, neg_big, s)

        # online softmax update for this head (all f32, all 2-D)
        m_prev = m_prev_all[:, h:h + 1]                              # (tq, 1)
        m_new = jnp.maximum(m_prev, jnp.max(s, axis=-1, keepdims=True))
        alpha = jnp.exp(m_prev - m_new)                              # (tq, 1)
        p = jnp.exp(s - m_new)                                       # (tq, tkv) f32
        l_new = alpha * l_prev_all[:, h:h + 1] + jnp.sum(p, axis=-1, keepdims=True)

        # p @ V in bf16 on the MXU, f32 accumulation
        pv = jnp.dot(p.astype(v_h.dtype), v_h,
                     preferred_element_type=jnp.float32)             # (tq, d_k) f32

        m_new_l.append(m_new)
        l_new_l.append(l_new)
        alpha_l.append(alpha)
        pv_l.append(pv)

    # Single full-lane-width rescale + accumulate (lane-expanded alpha), then compact
    # (tq, H) stat stores -- no per-head narrow VPU updates on padded vregs.
    alpha_full = jnp.concatenate(
        [jnp.broadcast_to(a, (tq, d_k)) for a in alpha_l], axis=-1)  # (tq, E)
    pv_full = jnp.concatenate(pv_l, axis=-1)                         # (tq, E)
    acc_sc[...] = alpha_full * acc_sc[...] + pv_full
    m_sc[...] = jnp.concatenate(m_new_l, axis=-1)                    # (tq, H)
    l_sc[...] = jnp.concatenate(l_new_l, axis=-1)                    # (tq, H)

    @pl.when(ki == pl.num_programs(2) - 1)
    def _():
        inv_l = pl.reciprocal(l_sc[...], approx=True)                # (tq, H) via EUP
        inv_full = jnp.concatenate(
            [jnp.broadcast_to(inv_l[:, h:h + 1], (tq, d_k)) for h in range(num_heads)],
            axis=-1)                                                 # (tq, E)
        o_ref[0] = (acc_sc[...] * inv_full).astype(o_ref.dtype)      # lane-dense store

    # TODO(synk): nn.Dropout(p=0.1) on p_attn is omitted (eval-mode / identity semantics).


def pallas_flash_attention(q, k, v, mask, *, num_heads, embed_dim,
                           q_col=0, k_col=0, v_col=0, tq=256, tkv=256):
    """q/k/v: (B, S, E) -- or the same fused (B, S, 3E) array with q/k/v_col = 0/1/2.
    mask: (B, S, S) int8 (1 = keep). Returns (B, S, E) with heads packed in E."""
    B, S, _ = q.shape
    E = embed_dim
    tq = _pick_tile(S, tq)
    tkv = _pick_tile(S, tkv)
    # keep at least 2 "parallel" grid iterations when possible (v7x: 2 TensorCores)
    if B * max(S // tq, 1) < 2 and tq % 256 == 0:
        tq //= 2
    grid = (B, S // tq, S // tkv)
    n_q = S // tq

    isz = q.dtype.itemsize
    block_bytes = (tq * tkv * mask.dtype.itemsize          # mask tile
                   + tq * E * isz                          # q tile
                   + 2 * tkv * E * isz                     # k + v tiles
                   + tq * E * isz)                         # out tile
    scratch_bytes = 2 * tq * 128 * 4 + tq * E * 4          # m/l (lane-padded) + acc

    kernel = functools.partial(_flash_attn_kernel, num_heads=num_heads)
    return pl.pallas_call(
        kernel,
        out_shape=jax.ShapeDtypeStruct((B, S, E), q.dtype),
        grid_spec=pltpu.PrefetchScalarGridSpec(
            num_scalar_prefetch=0,
            grid=grid,
            in_specs=[
                pl.BlockSpec((1, tq, tkv), lambda b, qi, ki: (b, qi, ki)),      # mask
                pl.BlockSpec((1, tq, E), lambda b, qi, ki: (b, qi, q_col)),     # q cols
                pl.BlockSpec((1, tkv, E), lambda b, qi, ki: (b, ki, k_col)),    # k cols
                pl.BlockSpec((1, tkv, E), lambda b, qi, ki: (b, ki, v_col)),    # v cols
            ],
            out_specs=pl.BlockSpec((1, tq, E), lambda b, qi, ki: (b, qi, 0)),
            scratch_shapes=[
                pltpu.VMEM((tq, num_heads), jnp.float32),   # running max (compact)
                pltpu.VMEM((tq, num_heads), jnp.float32),   # running sum (compact)
                pltpu.VMEM((tq, E), jnp.float32),           # lane-dense output accumulator
            ],
        ),
        compiler_params=pltpu.CompilerParams(
            dimension_semantics=("parallel", "parallel", "arbitrary"),
            vmem_limit_bytes=_vmem_limit(block_bytes, scratch_bytes)),
        cost_estimate=pl.CostEstimate(
            flops=4 * B * S * S * E,
            transcendentals=B * num_heads * S * S,
            bytes_accessed=(B * S * E * isz) * (2 + 2 * n_q) + B * S * S),
    )(mask, q, k, v)


# ---------------------------------------------------------------------------
# Parameter prep (done ONCE) + MultiHeadedAttention forward (wrapper / glue)
# ---------------------------------------------------------------------------
def prepare_mha_params(params, compute_dtype=jnp.bfloat16):
    """Fold 1/sqrt(d_k) into Wq/bq, pre-fuse Wqkv/bqkv, pre-cast weights to the MXU
    compute dtype -- all once at setup, not inside every forward call."""
    h = params["h"]
    (wq, bq), (wk, bk), (wv, bv), (wo, bo) = params["linears"]
    E = wq.shape[0]
    d_k = E // h
    scale = 1.0 / math.sqrt(d_k)
    wq_s, bq_s = wq * scale, bq * scale
    cd = jnp.dtype(compute_dtype)
    return {
        "h": h,
        "embed_dim": E,
        "compute_dtype": cd,
        # fused QKV (self-attention fast path): one matmul, activations read once
        "w_qkv": jnp.concatenate([wq_s, wk, wv], axis=0).astype(cd),     # (3E, E)
        "b_qkv": jnp.concatenate([bq_s, bk, bv], axis=0).astype(jnp.float32),
        # separate projections (cross-attention path); biases stay f32 (added to f32 acc)
        "wq": wq_s.astype(cd), "bq": bq_s.astype(jnp.float32),
        "wk": wk.astype(cd), "bk": bk.astype(jnp.float32),
        "wv": wv.astype(cd), "bv": bv.astype(jnp.float32),
        "wo": wo.astype(cd), "bo": bo.astype(jnp.float32),
    }


def multi_headed_attention(prepared, query, key, value, mask=None):
    """prepared: output of prepare_mha_params.  query/key/value: (B, S, E)."""
    B, S, E = query.shape
    h = prepared["h"]
    cd = prepared["compute_dtype"]
    out_dtype = query.dtype

    if mask is None:
        mask = jnp.ones((B, S, S), dtype=jnp.int8)
    mask = mask.astype(jnp.int8)

    xq = query.astype(cd).reshape(B * S, E)

    # NOTE: fused path is gated on Python object identity (self-attention); distinct
    # but numerically-equal arrays take the (numerically identical) unfused path.
    if (query is key) and (key is value) and (E % 128 == 0):
        qkv = pallas_linear(xq, prepared["w_qkv"], prepared["b_qkv"])    # (B*S, 3E) bf16
        qkv_bse = qkv.reshape(B, S, 3 * E)
        attn = pallas_flash_attention(qkv_bse, qkv_bse, qkv_bse, mask,
                                      num_heads=h, embed_dim=E,
                                      q_col=0, k_col=1, v_col=2)
    else:
        q_bse = pallas_linear(xq, prepared["wq"], prepared["bq"]).reshape(B, S, E)
        k_bse = pallas_linear(key.astype(cd).reshape(B * S, E),
                              prepared["wk"], prepared["bk"]).reshape(B, S, E)
        v_bse = pallas_linear(value.astype(cd).reshape(B * S, E),
                              prepared["wv"], prepared["bv"]).reshape(B, S, E)
        attn = pallas_flash_attention(q_bse, k_bse, v_bse, mask,
                                      num_heads=h, embed_dim=E)

    # final output projection writes the caller's dtype straight from the f32 acc
    out2d = pallas_linear(attn.reshape(B * S, E), prepared["wo"], prepared["bo"],
                          out_dtype=out_dtype)
    return out2d.reshape(B, S, E)


# ---------------------------------------------------------------------------
# Pure-JAX f32 reference (mirrors the PyTorch forward, eval-mode dropout)
# ---------------------------------------------------------------------------
def reference_mha(params, query, key, value, mask=None):
    B, S, E = query.shape
    h = params["h"]
    d_k = E // h
    (wq, bq), (wk, bk), (wv, bv), (wo, bo) = params["linears"]

    def lin(x, w, b):
        return x @ w.T + b

    def split(x):
        return x.reshape(B, S, h, d_k).transpose(0, 2, 1, 3)

    q, k, v = split(lin(query, wq, bq)), split(lin(key, wk, bk)), split(lin(value, wv, bv))
    scores = jnp.einsum("bhqd,bhkd->bhqk", q, k) / math.sqrt(d_k)
    if mask is None:
        mask = jnp.ones((B, S, S), dtype=jnp.int8)
    scores = jnp.where(mask[:, None, :, :] == 0, -1e9, scores)
    p = jax.nn.softmax(scores, axis=-1)
    x = jnp.einsum("bhqk,bhkd->bhqd", p, v)
    x = x.transpose(0, 2, 1, 3).reshape(B, S, E)
    return lin(x, wo, bo)


# ---------------------------------------------------------------------------
def make_params(key, h, embed_dim):
    assert embed_dim % h == 0
    linears = []
    bound = 1.0 / math.sqrt(embed_dim)
    for _ in range(4):
        kw, kb, key = jax.random.split(key, 3)
        w = jax.random.uniform(kw, (embed_dim, embed_dim), jnp.float32, -bound, bound)
        b = jax.random.uniform(kb, (embed_dim,), jnp.float32, -bound, bound)
        linears.append((w, b))
    return {"h": h, "linears": linears}


if __name__ == "__main__":
    B, S, E, H = 2, 128, 128, 4   # d_k = 32

    root = jax.random.PRNGKey(0)
    kp, kx, kq, kk, kv, km = jax.random.split(root, 6)

    raw_params = make_params(kp, H, E)
    params = prepare_mha_params(raw_params)   # scale-fold + QKV fuse + bf16 cast, once

    # random padding-style mask (1 = keep), at least one unmasked key per query row
    mask = (jax.random.uniform(km, (B, S, S)) > 0.2).astype(jnp.int8)
    mask = mask.at[:, :, 0].set(1)

    # --- self-attention: exercises the fused-QKV + packed-heads attention path ---
    x = jax.random.normal(kx, (B, S, E), jnp.float32)
    out = jax.block_until_ready(multi_headed_attention(params, x, x, x, mask))
    ref = reference_mha(raw_params, x, x, x, mask)
    assert out.shape == (B, S, E)
    err = float(jnp.max(jnp.abs(out - ref)))
    assert jnp.allclose(out, ref, atol=4e-2, rtol=4e-2), f"fused path max abs err {err}"

    # --- cross-attention: exercises the separate-projection path ---
    q_in = jax.random.normal(kq, (B, S, E), jnp.float32)
    k_in = jax.random.normal(kk, (B, S, E), jnp.float32)
    v_in = jax.random.normal(kv, (B, S, E), jnp.float32)
    out2 = jax.block_until_ready(multi_headed_attention(params, q_in, k_in, v_in, mask))
    ref2 = reference_mha(raw_params, q_in, k_in, v_in, mask)
    err2 = float(jnp.max(jnp.abs(out2 - ref2)))
    assert jnp.allclose(out2, ref2, atol=4e-2, rtol=4e-2), f"cross path max abs err {err2}"

    print("KERNEL_OK")
</pallas_src>

<mosaic_0001>
module attributes {stable_mosaic.version = 11 : i64} {
  func.func @_matmul_bias_kernel(%arg0: i32, %arg1: i32, %arg2: i32, %arg3: memref<256x128xbf16, #tpu.memory_space<vmem>>, %arg4: memref<384x128xbf16, #tpu.memory_space<vmem>>, %arg5: memref<1x384xf32, #tpu.memory_space<vmem>>, %arg6: memref<256x384xbf16, #tpu.memory_space<vmem>>, %arg7: memref<256x384xf32, #tpu.memory_space<vmem>>) attributes {dimension_semantics = [#tpu.dimension_semantics<parallel>, #tpu.dimension_semantics<parallel>, #tpu.dimension_semantics<arbitrary>], iteration_bounds = array<i64: 1, 1, 1>, scalar_prefetch = 0 : i64, scratch_operands = 1 : i64, tpu.core_type = #tpu.core_type<tc>, window_params = [{transform_indices = @transform_0, window_bounds = array<i64: 256, 128>}, {transform_indices = @transform_1, window_bounds = array<i64: 384, 128>}, {transform_indices = @transform_2, window_bounds = array<i64: 1, 384>}, {transform_indices = @transform_3, window_bounds = array<i64: 256, 384>}]} {
    %c0_i32 = arith.constant 0 : i32
    %0 = arith.cmpi eq, %arg2, %c0_i32 : i32
    %1 = arith.extui %0 : i1 to i32
    %c0_i32_0 = arith.constant 0 : i32
    %2 = arith.cmpi ne, %1, %c0_i32_0 : i32
    scf.if %2 {
      %cst_10 = arith.constant 0.000000e+00 : f32
      %12 = vector.broadcast %cst_10 : f32 to vector<256x384xf32>
      %c0_11 = arith.constant 0 : index
      %c0_12 = arith.constant 0 : index
      %13 = vector.load %arg7[%c0_11, %c0_12] : memref<256x384xf32, #tpu.memory_space<vmem>>, vector<256x384xf32>
      tpu.vector_store %arg7[%c0_11, %c0_12], %12 {strides = array<i32>} : memref<256x384xf32, #tpu.memory_space<vmem>>, vector<256x384xf32>,
    } else {
    }
    %c0 = arith.constant 0 : index
    %c0_1 = arith.constant 0 : index
    %3 = vector.load %arg7[%c0, %c0_1] : memref<256x384xf32, #tpu.memory_space<vmem>>, vector<256x384xf32>
    %c0_2 = arith.constant 0 : index
    %c0_3 = arith.constant 0 : index
    %4 = vector.load %arg3[%c0_2, %c0_3] : memref<256x128xbf16, #tpu.memory_space<vmem>>, vector<256x128xbf16>
    %c0_4 = arith.constant 0 : index
    %c0_5 = arith.constant 0 : index
    %5 = vector.load %arg4[%c0_4, %c0_5] : memref<384x128xbf16, #tpu.memory_space<vmem>>, vector<384x128xbf16>
    %cst = arith.constant dense<0.000000e+00> : vector<256x384xf32>
    %6 = tpu.matmul %4, %5, %cst {dimension_numbers = #tpu.dot_dimension_numbers<[1], [1], [0], [0], [0, 0, 1, 0], [], []>} : vector<256x128xbf16>, vector<384x128xbf16>, vector<256x384xf32> -> vector<256x384xf32>
    %7 = arith.addf %3, %6 : vector<256x384xf32>
    %c0_6 = arith.constant 0 : index
    %c0_7 = arith.constant 0 : index
    %8 = vector.load %arg7[%c0_6, %c0_7] : memref<256x384xf32, #tpu.memory_space<vmem>>, vector<256x384xf32>
    tpu.vector_store %arg7[%c0_6, %c0_7], %7 {strides = array<i32>} : memref<256x384xf32, #tpu.memory_space<vmem>>, vector<256x384xf32>,
    %c0_i32_8 = arith.constant 0 : i32
    %9 = arith.cmpi eq, %arg2, %c0_i32_8 : i32
    %10 = arith.extui %9 : i1 to i32
    %c0_i32_9 = arith.constant 0 : i32
    %11 = arith.cmpi ne, %10, %c0_i32_9 : i32
    scf.if %11 {
      %c0_10 = arith.constant 0 : index
      %c0_11 = arith.constant 0 : index
      %12 = vector.load %arg7[%c0_10, %c0_11] : memref<256x384xf32, #tpu.memory_space<vmem>>, vector<256x384xf32>
      %c0_12 = arith.constant 0 : index
      %c0_13 = arith.constant 0 : index
      %13 = vector.load %arg5[%c0_12, %c0_13] : memref<1x384xf32, #tpu.memory_space<vmem>>, vector<1x384xf32>
      %14 = vector.broadcast %13 : vector<1x384xf32> to vector<256x384xf32>
      %15 = arith.addf %12, %14 : vector<256x384xf32>
      %16 = arith.truncf %15 : vector<256x384xf32> to vector<256x384xbf16>
      %c0_14 = arith.constant 0 : index
      %c0_15 = arith.constant 0 : index
      %17 = vector.load %arg6[%c0_14, %c0_15] : memref<256x384xbf16, #tpu.memory_space<vmem>>, vector<256x384xbf16>
      tpu.vector_store %arg6[%c0_14, %c0_15], %16 {strides = array<i32>} : memref<256x384xbf16, #tpu.memory_space<vmem>>, vector<256x384xbf16>,
    } else {
    }
    return
  }
  func.func @transform_0(%arg0: i32, %arg1: i32, %arg2: i32) -> (i32, i32) {
    %c0_i32 = arith.constant 0 : i32
    return %arg0, %arg2 : i32, i32
  }
  func.func @transform_1(%arg0: i32, %arg1: i32, %arg2: i32) -> (i32, i32) {
    %c0_i32 = arith.constant 0 : i32
    return %arg1, %arg2 : i32, i32
  }
  func.func @transform_2(%arg0: i32, %arg1: i32, %arg2: i32) -> (i32, i32) {
    %c0_i32 = arith.constant 0 : i32
    %c0_i32_0 = arith.constant 0 : i32
    return %c0_i32, %arg1 : i32, i32
  }
  func.func @transform_3(%arg0: i32, %arg1: i32, %arg2: i32) -> (i32, i32) {
    %c0_i32 = arith.constant 0 : i32
    return %arg0, %arg1 : i32, i32
  }
}

</mosaic_0001>

<bundles_post_ra>
// kernel: tpu_custom_call.1
= control target key start
LH: loop header
LB: loop body
LE: loop exit
PB: predicated region body
PF: predicated region fallthrough
CT: control target
= control target key end

     0   :  { %8 = vsyncpa [#allocation4], 0  ;;  %s2262_s0 = inlined_call_operand.hbm [shape: bf16[256,128], index: 0, kind: input, shape index: {}]   ;;  %s2263_s1 = inlined_call_operand.hbm [shape: bf16[384,128], index: 1, kind: input, shape index: {}]   ;;  %s2264_s2 = inlined_call_operand.vmem [shape: f32[1,384], index: 2, kind: input, shape index: {}]   ;;  %s2265_s3 = inlined_call_operand.hbm [shape: bf16[256,384], index: 3, kind: output, shape index: {}]  }
   0x1   :  { %9 = vsyncpa [#allocation7], 0 }
   0x2   :  { %10 = vsyncpa [#allocation5], 0  ;;  %s2121_s12 = smov [#allocation3]  }
   0x3   :  { %s16_s13 = sshll.u32 %s2121_s12, 4  ;;  %s17_s13 = int_to_ptr.vmem [resolvable:$true] %s16_s13 }
   0x4   :  { %s2063_s14 = scalar_lea.vmem %s17_s13, 2048  ;;  %p2068_p1 = scmp.lt.s32.totalorder %s17_s13, %s17_s13 }
   0x5   :  { %p2064_p0 = scmp.ne.s32.totalorder %s17_s13, %s2063_s14  ;;  %p2069_p2 = scmp.lt.s32.totalorder %s2063_s14, %s2063_s14 }
   0x7   :  { %p2070_p3 = por %p2069_p2, %p2068_p1 }
   0x9   :  { %p2071_p4 = pnand %p2070_p3, %p2064_p0 }
   0xb   :  { %2074 = shalt.err (!%p2071_p4)
}
   0xc   :  { %s2122_s15 = smov 64   ;;  %s2123_s16 = smov 4  }
   0xd   :  { %22 = dma.hbm_to_vmem [thread:$0]  %s2262_s0, 2048, %s17_s13, [#allocation4], %s2122_s15, %s2122_s15, %s2123_s16  }
   0xe   :  { %s2124_s19 = smov [#allocation6]  }
   0xf   :  { %s28_s20 = sshll.u32 %s2124_s19, 4  ;;  %s29_s20 = int_to_ptr.vmem [resolvable:$true] %s28_s20 }
  0x10   :  { %s2083_s21 = scalar_lea.vmem %s29_s20, 3072  ;;  %p2088_p6 = scmp.lt.s32.totalorder %s29_s20, %s29_s20 }
  0x11   :  { %p2084_p5 = scmp.ne.s32.totalorder %s29_s20, %s2083_s21  ;;  %p2089_p7 = scmp.lt.s32.totalorder %s2083_s21, %s2083_s21 }
  0x13   :  { %p2090_p8 = por %p2089_p7, %p2088_p6 }
  0x15   :  { %p2091_p9 = pnand %p2090_p8, %p2084_p5 }
  0x17   :  { %2094 = shalt.err (!%p2091_p9)
}
  0x18   :  { %34 = dma.hbm_to_vmem [thread:$0]  %s2263_s1, 3072, %s29_s20, [#allocation7], %s2122_s15, %s2122_s15, %s2123_s16  }
  0x19   :  { %2115 = dma.done.wait [#allocation4], 2048  }
  0x1a   :  { %2116 = vsyncadd [#allocation4], 4294965248 }
  0x1b   :  { %2117 = dma.done.wait [#allocation7], 3072  }
  0x1c   :  { %2118 = vsyncadd [#allocation7], 4294964224  ;;  %v2015_v0 = vld [vmem:[#allocation6 + $0x78] sm:$0xff]   ;;  %v2017_v2 = vld [vmem:[#allocation6 + $0x70] sm:$0xff]   ;;  %v1207_v40 = vlaneseq }
  0x1d   :  { %v2016_v1 = vld [vmem:[#allocation6 + $0x38] sm:$0xff]   ;;  %1888 = vmatprep.subr.bf16.mxu0 %v2015_v0  ;;  %v2018_v3 = vld [vmem:[#allocation6 + $0x30] sm:$0xff]   ;;  %v2019_v4 = vld [vmem:[#allocation6 + $0x68] sm:$0xff]  }
  0x1e   :  { %1889 = vmatpush3.bf16.xpose.msra.mxu0 %v2016_v1  ;;  %v2020_v5 = vld [vmem:[#allocation6 + $0x28] sm:$0xff]   ;;  %v2021_v6 = vld [vmem:[#allocation6 + $0x60] sm:$0xff]   ;;  %v2031_v7 = vld [vmem:[#allocation6 + $0xb8] sm:$0xff]   ;;  %v1208_v41 = vshrl.u32 %v1207_v40, 7 }
  0x1f   :  { %1890 = vmatprep.subr.bf16.mxu0 %v2017_v2  ;;  %v2032_v8 = vld [vmem:[#allocation3] sm:$0xff]   ;;  %1960 = vmatprep.subr.bf16.mxu1 %v2031_v7  ;;  %v2033_v9 = vld [vmem:[#allocation6 + $0xb0] sm:$0xff]   ;;  %v2023_v11 = vld [vmem:[#allocation6 + $0x58] sm:$0xff]  }
  0x20   :  { %1961 = vmatpush3.bf16.xpose.msra.mxu1 %v2031_v7  ;;  %1904 = vmatprep.mubr.bf16.mxu0 %v2032_v8  ;;  %v2022_v10 = vld [vmem:[#allocation6 + $0x20] sm:$0xff]   ;;  %v2035_v12 = vld [vmem:[#allocation6 + $0xa8] sm:$0xff]   ;;  %v2024_v13 = vld [vmem:[#allocation6 + $0x18] sm:$0xff]   ;;  %v1209_v42 = vsub.s32 0, %v1208_v41  ;;  %v1213_v43 = vsub.s32 1, %v1208_v41  ;;  %v1217_v58 = vsub.s32 2, %v1208_v41 }
  0x21   :  { %1962 = vmatprep.subr.bf16.mxu1 %v2033_v9  ;;  %1976 = vmatprep.mubr.bf16.mxu1 %v2032_v8  ;;  %v2025_v14 = vld [vmem:[#allocation6 + $0x50] sm:$0xff]   ;;  %v2037_v15 = vld [vmem:[#allocation6 + $0xa0] sm:$0xff]   ;;  %v2027_v17 = vld [vmem:[#allocation6 + $0x48] sm:$0xff]  }
  0x22   :  { %v2026_v16 = vld [vmem:[#allocation6 + $0x10] sm:$0xff]   ;;  %v2039_v18 = vld [vmem:[#allocation6 + $0x98] sm:$0xff]   ;;  %v2028_v19 = vld [vmem:[#allocation6 + $0x8] sm:$0xff]  }
  0x23   :  { %v2029_v20 = vld [vmem:[#allocation6 + $0x40] sm:$0xff]   ;;  %v2041_v21 = vld [vmem:[#allocation6 + $0x90] sm:$0xff]   ;;  %v2043_v23 = vld [vmem:[#allocation6 + $0x88] sm:$0xff]  }
  0x24   :  { %v2030_v22 = vld [vmem:[#allocation6] sm:$0xff]   ;;  %v2034_v24 = vld [vmem:[#allocation3 + $0x8] sm:$0xff]   ;;  %v2036_v26 = vld [vmem:[#allocation3 + $0x10] sm:$0xff]  }
  0x25   :  { %v2045_v25 = vld [vmem:[#allocation6 + $0x80] sm:$0xff]   ;;  %v2038_v27 = vld [vmem:[#allocation3 + $0x18] sm:$0xff]   ;;  %v2042_v29 = vld [vmem:[#allocation3 + $0x28] sm:$0xff]  }
  0x26   :  { %1891 = vmatpush3.bf16.xpose.msra.mxu0 %v2018_v3  ;;  %v2040_v28 = vld [vmem:[#allocation3 + $0x20] sm:$0xff]   ;;  %v2044_v30 = vld [vmem:[#allocation3 + $0x30] sm:$0xff]   ;;  %v2046_v31 = vld [vmem:[#allocation3 + $0x38] sm:$0xff]  }
  0x27   :  { %1892 = vmatprep.subr.bf16.mxu0 %v2019_v4  ;;  %v2047_v32 = vld [vmem:[#allocation3 + $0x40] sm:$0xff]   ;;  %v2048_v33 = vld [vmem:[#allocation3 + $0x48] sm:$0xff]   ;;  %v2049_v34 = vld [vmem:[#allocation3 + $0x50] sm:$0xff]  }
  0x28   :  { %1963 = vmatpush3.bf16.xpose.msra.mxu1 %v2033_v9  ;;  %v2050_v35 = vld [vmem:[#allocation3 + $0x58] sm:$0xff]   ;;  %v2051_v36 = vld [vmem:[#allocation3 + $0x60] sm:$0xff]   ;;  %v2052_v37 = vld [vmem:[#allocation3 + $0x68] sm:$0xff]  }
  0x29   :  { %1964 = vmatprep.subr.bf16.mxu1 %v2035_v12  ;;  %v2053_v38 = vld [vmem:[#allocation3 + $0x70] sm:$0xff]   ;;  %v2054_v39 = vld [vmem:[#allocation3 + $0x78] sm:$0xff]   ;;  %v1205_v44 = vld [vmem:[%s2264_s2] sm:$0x7]  ;;  %s2125_s2 = smov [#allocation8]  }
  0x2a   :  { %v2157_v45 = vrot.slane %v1205_v44, %v1209_v42  ;;  %v2159_v46 = vrot.slane %v1205_v44, %v1213_v43  ;;  %v2167_v0 = vrot.slane %v1205_v44, %v1217_v58  ;;  %s1707_s24 = sshll.u32 %s2125_s2, 4  ;;  %s1708_s24 = int_to_ptr.vmem [resolvable:$true] %s1707_s24 }
  0x2b   :  { %s2095_s25 = scalar_lea.vmem %s1708_s24, 6144  ;;  %p2100_p11 = scmp.lt.s32.totalorder %s1708_s24, %s1708_s24 }
  0x2c   :  { %p2096_p10 = scmp.ne.s32.totalorder %s1708_s24, %s2095_s25  ;;  %p2101_p12 = scmp.lt.s32.totalorder %s2095_s25, %s2095_s25 }
  0x2e   :  { %1893 = vmatpush3.bf16.xpose.msra.mxu0 %v2020_v5  ;;  %p2102_p13 = por %p2101_p12, %p2100_p11 }
  0x2f   :  { %1894 = vmatprep.subr.bf16.mxu0 %v2021_v6 }
  0x30   :  { %1965 = vmatpush3.bf16.xpose.msra.mxu1 %v2035_v12  ;;  %p2103_p0 = pnand %p2102_p13, %p2096_p10 }
  0x31   :  { %1966 = vmatprep.subr.bf16.mxu1 %v2037_v15 }
  0x36   :  { %1895 = vmatpush3.bf16.xpose.msra.mxu0 %v2022_v10 }
  0x37   :  { %1896 = vmatprep.subr.bf16.mxu0 %v2023_v11 }
  0x38   :  { %1967 = vmatpush3.bf16.xpose.msra.mxu1 %v2037_v15 }
  0x39   :  { %1968 = vmatprep.subr.bf16.mxu1 %v2039_v18 }
  0x3e   :  { %1897 = vmatpush3.bf16.xpose.msra.mxu0 %v2024_v13 }
  0x3f   :  { %1898 = vmatprep.subr.bf16.mxu0 %v2025_v14 }
  0x40   :  { %1969 = vmatpush3.bf16.xpose.msra.mxu1 %v2039_v18 }
  0x41   :  { %1970 = vmatprep.subr.bf16.mxu1 %v2041_v21 }
  0x46   :  { %1899 = vmatpush3.bf16.xpose.msra.mxu0 %v2026_v16 }
  0x47   :  { %1900 = vmatprep.subr.bf16.mxu0 %v2027_v17 }
  0x48   :  { %1971 = vmatpush3.bf16.xpose.msra.mxu1 %v2041_v21 }
  0x49   :  { %1972 = vmatprep.subr.bf16.mxu1 %v2043_v23 }
  0x4e   :  { %1901 = vmatpush3.bf16.xpose.msra.mxu0 %v2028_v19 }
  0x4f   :  { %1902 = vmatprep.subr.bf16.mxu0 %v2029_v20 }
  0x50   :  { %1973 = vmatpush3.bf16.xpose.msra.mxu1 %v2043_v23 }
  0x51   :  { %1974 = vmatprep.subr.bf16.mxu1 %v2045_v25 }
  0x56   :  { %1903 = vmatpush3.bf16.xpose.msra.mxu0 %v2030_v22 }
  0x58   :  { %1975 = vmatpush3.bf16.xpose.msra.mxu1 %v2045_v25 }
  0x5d   :  { %1905 = vmatmul.mubr.bf16.vlgmr.msra.gmra.mxu0 %v2032_v8 }
  0x5e   :  { %1906 = vmatprep.mubr.bf16.mxu0 %v2034_v24 }
  0x5f   :  { %1977 = vmatmul.mubr.bf16.vlgmr.msra.gmra.mxu1 %v2034_v24 }
  0x60   :  { %1980 = vmatprep.mubr.bf16.mxu1 %v2036_v26 }
  0x65   :  { %1907 = vmatmul.mubr.bf16.gmra.mxu0 %v2034_v24 }
  0x66   :  { %1908 = vmatprep.mubr.bf16.mxu0 %v2036_v26 }
  0x67   :  { %1981 = vmatmul.mubr.bf16.gmra.mxu1 %v2038_v27 }
  0x68   :  { %1984 = vmatprep.mubr.bf16.mxu1 %v2040_v28 }
  0x6d   :  { %1909 = vmatmul.mubr.bf16.gmra.mxu0 %v2036_v26 }
  0x6e   :  { %1910 = vmatprep.mubr.bf16.mxu0 %v2038_v27 }
  0x6f   :  { %1985 = vmatmul.mubr.bf16.gmra.mxu1 %v2042_v29 }
  0x70   :  { %1988 = vmatprep.mubr.bf16.mxu1 %v2044_v30 }
  0x75   :  { %1911 = vmatmul.mubr.bf16.gmra.mxu0 %v2038_v27 }
  0x76   :  { %1912 = vmatprep.mubr.bf16.mxu0 %v2040_v28 }
  0x77   :  { %1989 = vmatmul.mubr.bf16.gmra.mxu1 %v2046_v31 }
  0x78   :  { %1992 = vmatprep.mubr.bf16.mxu1 %v2047_v32 }
  0x7d   :  { %1913 = vmatmul.mubr.bf16.gmra.mxu0 %v2040_v28 }
  0x7e   :  { %1914 = vmatprep.mubr.bf16.mxu0 %v2042_v29 }
  0x7f   :  { %1993 = vmatmul.mubr.bf16.gmra.mxu1 %v2048_v33 }
  0x80   :  { %1996 = vmatprep.mubr.bf16.mxu1 %v2049_v34 }
  0x85   :  { %1915 = vmatmul.mubr.bf16.gmra.mxu0 %v2042_v29 }
  0x86   :  { %1916 = vmatprep.mubr.bf16.mxu0 %v2044_v30 }
  0x87   :  { %1997 = vmatmul.mubr.bf16.gmra.mxu1 %v2050_v35 }
  0x88   :  { %2000 = vmatprep.mubr.bf16.mxu1 %v2051_v36 }
  0x8d   :  { %1917 = vmatmul.mubr.bf16.gmra.mxu0 %v2044_v30 }
  0x8e   :  { %1918 = vmatprep.mubr.bf16.mxu0 %v2046_v31 }
  0x8f   :  { %2001 = vmatmul.mubr.bf16.gmra.mxu1 %v2052_v37 }
  0x90   :  { %2004 = vmatprep.mubr.bf16.mxu1 %v2053_v38 }
  0x95   :  { %1919 = vmatmul.mubr.bf16.gmra.mxu0 %v2046_v31 }
  0x96   :  { %1920 = vmatprep.mubr.bf16.mxu0 %v2047_v32 }
  0x97   :  { %2005 = vmatmul.mubr.bf16.gmra.mxu1 %v2054_v39 }
  0x9d   :  { %1921 = vmatmul.mubr.bf16.gmra.mxu0 %v2047_v32 }
  0x9e   :  { %1922 = vmatprep.mubr.bf16.mxu0 %v2048_v33 }
  0xa5   :  { %1923 = vmatmul.mubr.bf16.gmra.mxu0 %v2048_v33 }
  0xa6   :  { %1924 = vmatprep.mubr.bf16.mxu0 %v2049_v34 }
  0xad   :  { %1925 = vmatmul.mubr.bf16.gmra.mxu0 %v2049_v34 }
  0xae   :  { %1926 = vmatprep.mubr.bf16.mxu0 %v2050_v35 }
  0xb5   :  { %1927 = vmatmul.mubr.bf16.gmra.mxu0 %v2050_v35 }
  0xb6   :  { %1928 = vmatprep.mubr.bf16.mxu0 %v2051_v36 }
  0xbd   :  { %1929 = vmatmul.mubr.bf16.gmra.mxu0 %v2051_v36 }
  0xbe   :  { %1930 = vmatprep.mubr.bf16.mxu0 %v2052_v37 }
  0xc5   :  { %1931 = vmatmul.mubr.bf16.gmra.mxu0 %v2052_v37 }
  0xc6   :  { %1932 = vmatprep.mubr.bf16.mxu0 %v2053_v38 }
  0xcd   :  { %1933 = vmatmul.mubr.bf16.gmra.mxu0 %v2053_v38 }
  0xce   :  { %1934 = vmatprep.mubr.bf16.mxu0 %v2054_v39 }
  0xd5   :  { %1935 = vmatmul.mubr.bf16.gmra.mxu0 %v2054_v39 }
 0x11d   :  { %v594_v47 = vpop.f32.mrf.mxu0 }
 0x11e   :  { %v1222_v49 = vadd.f32 %v2157_v45, %v594_v47 }
 0x11f   :  { %v596_v48 = vpop.f32.mrf.mxu0  ;;  %v1978_v5 = vpop.f32.mrf.mxu1 }
 0x120   :  { %v1223_v50 = vadd.f32 %v2159_v46, %v596_v48  ;;  %v1230_v7 = vadd.f32 %v1978_v5, %v2167_v0 }
 0x121   :  { %v598_v51 = vpop.f32.mrf.mxu0  ;;  %v787_v9 = vpop.f32.mrf.mxu1 }
 0x122   :  { %v1824_v52 = vpack.c.bf16 %v1223_v50, %v1222_v49  ;;  %v1225_v54 = vadd.f32 %v2157_v45, %v598_v51  ;;  %v1829_v12 = vpack.c.bf16 %v1230_v7, %v1230_v7  ;;  %v1224_v13 = vadd.f32 %v2167_v0, %v787_v9 }
 0x123   :  { %v600_v53 = vpop.f32.mrf.mxu0  ;;  %v1979_v15 = vpop.f32.mrf.mxu1 }
 0x124   :  { %1638 = vst [vmem:[#allocation8] sm:$0xff] %v1824_v52  ;;  %v1226_v55 = vadd.f32 %v2159_v46, %v600_v53  ;;  %1643 = vst [vmem:[#allocation8 + $0x20] sm:$0xf] %v1829_v12  ;;  %v1825_v17 = vpack.c.bf16 %v1224_v13, %v1224_v13  ;;  %v1233_v18 = vadd.f32 %v1979_v15, %v2167_v0 }
 0x125   :  { %v604_v56 = vpop.f32.mrf.mxu0  ;;  %v790_v20 = vpop.f32.mrf.mxu1 }
 0x126   :  { %v1826_v57 = vpack.c.bf16 %v1226_v55, %v1225_v54  ;;  %v1228_v60 = vadd.f32 %v2157_v45, %v604_v56  ;;  %1639 = vst [vmem:[#allocation8 + $0x8] sm:$0xf] %v1825_v17  ;;  %v1831_v23 = vpack.c.bf16 %v1233_v18, %v1233_v18  ;;  %v1227_v24 = vadd.f32 %v2167_v0, %v790_v20 }
 0x127   :  { %v606_v59 = vpop.f32.mrf.mxu0  ;;  %v1982_v26 = vpop.f32.mrf.mxu1 }
 0x128   :  { %1640 = vst [vmem:[#allocation8 + $0xc] sm:$0xff] %v1826_v57  ;;  %v1229_v61 = vadd.f32 %v2159_v46, %v606_v59  ;;  %1645 = vst [vmem:[#allocation8 + $0x2c] sm:$0xf] %v1831_v23  ;;  %v1827_v28 = vpack.c.bf16 %v1227_v24, %v1227_v24  ;;  %v1242_v29 = vadd.f32 %v1982_v26, %v2167_v0 }
 0x129   :  { %v608_v62 = vpop.f32.mrf.mxu0  ;;  %v803_v31 = vpop.f32.mrf.mxu1 }
 0x12a   :  { %v1828_v63 = vpack.c.bf16 %v1229_v61, %v1228_v60  ;;  %v1231_v2 = vadd.f32 %v2157_v45, %v608_v62  ;;  %1641 = vst [vmem:[#allocation8 + $0x14] sm:$0xf] %v1827_v28  ;;  %v1837_v34 = vpack.c.bf16 %v1242_v29, %v1242_v29  ;;  %v1236_v35 = vadd.f32 %v2167_v0, %v803_v31 }
 0x12b   :  { %v610_v1 = vpop.f32.mrf.mxu0  ;;  %v1983_v37 = vpop.f32.mrf.mxu1 }
 0x12c   :  { %1642 = vst [vmem:[#allocation8 + $0x18] sm:$0xff] %v1828_v63  ;;  %v1232_v3 = vadd.f32 %v2159_v46, %v610_v1  ;;  %1651 = vst [vmem:[#allocation8 + $0x50] sm:$0xf] %v1837_v34  ;;  %v1833_v39 = vpack.c.bf16 %v1236_v35, %v1236_v35  ;;  %v1245_v40 = vadd.f32 %v1983_v37, %v2167_v0 }
 0x12d   :  { %v614_v4 = vpop.f32.mrf.mxu0  ;;  %v806_v42 = vpop.f32.mrf.mxu1 }
 0x12e   :  { %v1830_v6 = vpack.c.bf16 %v1232_v3, %v1231_v2  ;;  %v1234_v10 = vadd.f32 %v2157_v45, %v614_v4  ;;  %1647 = vst [vmem:[#allocation8 + $0x38] sm:$0xf] %v1833_v39  ;;  %v1839_v47 = vpack.c.bf16 %v1245_v40, %v1245_v40  ;;  %v1239_v48 = vadd.f32 %v2167_v0, %v806_v42 }
 0x12f   :  { %v616_v8 = vpop.f32.mrf.mxu0  ;;  %v1986_v50 = vpop.f32.mrf.mxu1 }
 0x130   :  { %1644 = vst [vmem:[#allocation8 + $0x24] sm:$0xff] %v1830_v6  ;;  %v1235_v11 = vadd.f32 %v2159_v46, %v616_v8  ;;  %1653 = vst [vmem:[#allocation8 + $0x5c] sm:$0xf] %v1839_v47  ;;  %v1835_v52 = vpack.c.bf16 %v1239_v48, %v1239_v48  ;;  %v1254_v53 = vadd.f32 %v1986_v50, %v2167_v0 }
 0x131   :  { %v618_v14 = vpop.f32.mrf.mxu0  ;;  %v819_v55 = vpop.f32.mrf.mxu1 }
 0x132   :  { %v1832_v16 = vpack.c.bf16 %v1235_v11, %v1234_v10  ;;  %v1237_v21 = vadd.f32 %v2157_v45, %v618_v14  ;;  %1649 = vst [vmem:[#allocation8 + $0x44] sm:$0xf] %v1835_v52  ;;  %v1845_v58 = vpack.c.bf16 %v1254_v53, %v1254_v53  ;;  %v1248_v59 = vadd.f32 %v2167_v0, %v819_v55 }
 0x133   :  { %v620_v19 = vpop.f32.mrf.mxu0  ;;  %v1987_v61 = vpop.f32.mrf.mxu1 }
 0x134   :  { %1646 = vst [vmem:[#allocation8 + $0x30] sm:$0xff] %v1832_v16  ;;  %v1238_v22 = vadd.f32 %v2159_v46, %v620_v19  ;;  %1659 = vst [vmem:[#allocation8 + $0x80] sm:$0xf] %v1845_v58  ;;  %v1841_v63 = vpack.c.bf16 %v1248_v59, %v1248_v59  ;;  %v1257_v1 = vadd.f32 %v1987_v61, %v2167_v0 }
 0x135   :  { %v624_v25 = vpop.f32.mrf.mxu0  ;;  %v822_v3 = vpop.f32.mrf.mxu1 }
 0x136   :  { %v1834_v27 = vpack.c.bf16 %v1238_v22, %v1237_v21  ;;  %v1240_v32 = vadd.f32 %v2157_v45, %v624_v25  ;;  %1655 = vst [vmem:[#allocation8 + $0x68] sm:$0xf] %v1841_v63  ;;  %v1847_v6 = vpack.c.bf16 %v1257_v1, %v1257_v1  ;;  %v1251_v7 = vadd.f32 %v2167_v0, %v822_v3 }
 0x137   :  { %v626_v30 = vpop.f32.mrf.mxu0  ;;  %v1990_v9 = vpop.f32.mrf.mxu1 }
 0x138   :  { %1648 = vst [vmem:[#allocation8 + $0x3c] sm:$0xff] %v1834_v27  ;;  %v1241_v33 = vadd.f32 %v2159_v46, %v626_v30  ;;  %1661 = vst [vmem:[#allocation8 + $0x8c] sm:$0xf] %v1847_v6  ;;  %v1843_v11 = vpack.c.bf16 %v1251_v7, %v1251_v7  ;;  %v1266_v12 = vadd.f32 %v1990_v9, %v2167_v0 }
 0x139   :  { %v628_v36 = vpop.f32.mrf.mxu0  ;;  %v835_v14 = vpop.f32.mrf.mxu1 }
 0x13a   :  { %v1836_v38 = vpack.c.bf16 %v1241_v33, %v1240_v32  ;;  %v1243_v43 = vadd.f32 %v2157_v45, %v628_v36  ;;  %1657 = vst [vmem:[#allocation8 + $0x74] sm:$0xf] %v1843_v11  ;;  %v1853_v17 = vpack.c.bf16 %v1266_v12, %v1266_v12  ;;  %v1260_v18 = vadd.f32 %v2167_v0, %v835_v14 }
 0x13b   :  { %v630_v41 = vpop.f32.mrf.mxu0  ;;  %v1991_v20 = vpop.f32.mrf.mxu1 }
 0x13c   :  { %1650 = vst [vmem:[#allocation8 + $0x48] sm:$0xff] %v1836_v38  ;;  %v1244_v44 = vadd.f32 %v2159_v46, %v630_v41  ;;  %1667 = vst [vmem:[#allocation8 + $0xb0] sm:$0xf] %v1853_v17  ;;  %v1849_v22 = vpack.c.bf16 %v1260_v18, %v1260_v18  ;;  %v1269_v23 = vadd.f32 %v1991_v20, %v2167_v0 }
 0x13d   :  { %v634_v49 = vpop.f32.mrf.mxu0  ;;  %v838_v25 = vpop.f32.mrf.mxu1 }
 0x13e   :  { %v1838_v51 = vpack.c.bf16 %v1244_v44, %v1243_v43  ;;  %v1246_v56 = vadd.f32 %v2157_v45, %v634_v49  ;;  %1663 = vst [vmem:[#allocation8 + $0x98] sm:$0xf] %v1849_v22  ;;  %v1855_v28 = vpack.c.bf16 %v1269_v23, %v1269_v23  ;;  %v1263_v29 = vadd.f32 %v2167_v0, %v838_v25 }
 0x13f   :  { %v636_v54 = vpop.f32.mrf.mxu0  ;;  %v1994_v31 = vpop.f32.mrf.mxu1 }
 0x140   :  { %1652 = vst [vmem:[#allocation8 + $0x54] sm:$0xff] %v1838_v51  ;;  %v1247_v57 = vadd.f32 %v2159_v46, %v636_v54  ;;  %1669 = vst [vmem:[#allocation8 + $0xbc] sm:$0xf] %v1855_v28  ;;  %v1851_v33 = vpack.c.bf16 %v1263_v29, %v1263_v29  ;;  %v1278_v34 = vadd.f32 %v1994_v31, %v2167_v0 }
 0x141   :  { %v638_v60 = vpop.f32.mrf.mxu0  ;;  %v851_v36 = vpop.f32.mrf.mxu1 }
 0x142   :  { %v1840_v62 = vpack.c.bf16 %v1247_v57, %v1246_v56  ;;  %v1249_v4 = vadd.f32 %v2157_v45, %v638_v60  ;;  %1665 = vst [vmem:[#allocation8 + $0xa4] sm:$0xf] %v1851_v33  ;;  %v1861_v39 = vpack.c.bf16 %v1278_v34, %v1278_v34  ;;  %v1272_v40 = vadd.f32 %v2167_v0, %v851_v36 }
 0x143   :  { %v640_v2 = vpop.f32.mrf.mxu0  ;;  %v1995_v42 = vpop.f32.mrf.mxu1 }
 0x144   :  { %1654 = vst [vmem:[#allocation8 + $0x60] sm:$0xff] %v1840_v62  ;;  %v1250_v5 = vadd.f32 %v2159_v46, %v640_v2  ;;  %1675 = vst [vmem:[#allocation8 + $0xe0] sm:$0xf] %v1861_v39  ;;  %v1857_v44 = vpack.c.bf16 %v1272_v40, %v1272_v40  ;;  %v1281_v47 = vadd.f32 %v1995_v42, %v2167_v0 }
 0x145   :  { %v644_v8 = vpop.f32.mrf.mxu0  ;;  %v854_v49 = vpop.f32.mrf.mxu1 }
 0x146   :  { %v1842_v10 = vpack.c.bf16 %v1250_v5, %v1249_v4  ;;  %v1252_v15 = vadd.f32 %v2157_v45, %v644_v8  ;;  %1671 = vst [vmem:[#allocation8 + $0xc8] sm:$0xf] %v1857_v44  ;;  %v1863_v52 = vpack.c.bf16 %v1281_v47, %v1281_v47  ;;  %v1275_v53 = vadd.f32 %v2167_v0, %v854_v49 }
 0x147   :  { %v646_v13 = vpop.f32.mrf.mxu0  ;;  %v1998_v55 = vpop.f32.mrf.mxu1 }
 0x148   :  { %1656 = vst [vmem:[#allocation8 + $0x6c] sm:$0xff] %v1842_v10  ;;  %v1253_v16 = vadd.f32 %v2159_v46, %v646_v13  ;;  %1677 = vst [vmem:[#allocation8 + $0xec] sm:$0xf] %v1863_v52  ;;  %v1859_v57 = vpack.c.bf16 %v1275_v53, %v1275_v53  ;;  %v1290_v58 = vadd.f32 %v1998_v55, %v2167_v0 }
 0x149   :  { %v648_v19 = vpop.f32.mrf.mxu0  ;;  %v867_v60 = vpop.f32.mrf.mxu1 }
 0x14a   :  { %v1844_v21 = vpack.c.bf16 %v1253_v16, %v1252_v15  ;;  %v1255_v26 = vadd.f32 %v2157_v45, %v648_v19  ;;  %1673 = vst [vmem:[#allocation8 + $0xd4] sm:$0xf] %v1859_v57  ;;  %v1869_v63 = vpack.c.bf16 %v1290_v58, %v1290_v58  ;;  %v1284_v1 = vadd.f32 %v2167_v0, %v867_v60 }
 0x14b   :  { %v650_v24 = vpop.f32.mrf.mxu0  ;;  %v1999_v3 = vpop.f32.mrf.mxu1 }
 0x14c   :  { %1658 = vst [vmem:[#allocation8 + $0x78] sm:$0xff] %v1844_v21  ;;  %v1256_v27 = vadd.f32 %v2159_v46, %v650_v24  ;;  %1683 = vst [vmem:[#allocation8 + $0x110] sm:$0xf] %v1869_v63  ;;  %v1865_v5 = vpack.c.bf16 %v1284_v1, %v1284_v1  ;;  %v1293_v6 = vadd.f32 %v1999_v3, %v2167_v0 }
 0x14d   :  { %v654_v30 = vpop.f32.mrf.mxu0  ;;  %v870_v8 = vpop.f32.mrf.mxu1 }
 0x14e   :  { %v1846_v32 = vpack.c.bf16 %v1256_v27, %v1255_v26  ;;  %v1258_v37 = vadd.f32 %v2157_v45, %v654_v30  ;;  %1679 = vst [vmem:[#allocation8 + $0xf8] sm:$0xf] %v1865_v5  ;;  %v1871_v11 = vpack.c.bf16 %v1293_v6, %v1293_v6  ;;  %v1287_v12 = vadd.f32 %v2167_v0, %v870_v8 }
 0x14f   :  { %v656_v35 = vpop.f32.mrf.mxu0  ;;  %v2002_v14 = vpop.f32.mrf.mxu1 }
 0x150   :  { %1660 = vst [vmem:[#allocation8 + $0x84] sm:$0xff] %v1846_v32  ;;  %v1259_v38 = vadd.f32 %v2159_v46, %v656_v35  ;;  %1685 = vst [vmem:[#allocation8 + $0x11c] sm:$0xf] %v1871_v11  ;;  %v1867_v16 = vpack.c.bf16 %v1287_v12, %v1287_v12  ;;  %v1302_v17 = vadd.f32 %v2002_v14, %v2167_v0 }
 0x151   :  { %v658_v41 = vpop.f32.mrf.mxu0  ;;  %v883_v19 = vpop.f32.mrf.mxu1 }
 0x152   :  { %v1848_v43 = vpack.c.bf16 %v1259_v38, %v1258_v37  ;;  %v1261_v50 = vadd.f32 %v2157_v45, %v658_v41  ;;  %1681 = vst [vmem:[#allocation8 + $0x104] sm:$0xf] %v1867_v16  ;;  %v1877_v22 = vpack.c.bf16 %v1302_v17, %v1302_v17  ;;  %v1296_v23 = vadd.f32 %v2167_v0, %v883_v19 }
 0x153   :  { %v660_v48 = vpop.f32.mrf.mxu0  ;;  %v2003_v25 = vpop.f32.mrf.mxu1 }
 0x154   :  { %1662 = vst [vmem:[#allocation8 + $0x90] sm:$0xff] %v1848_v43  ;;  %v1262_v51 = vadd.f32 %v2159_v46, %v660_v48  ;;  %1691 = vst [vmem:[#allocation8 + $0x140] sm:$0xf] %v1877_v22  ;;  %v1873_v27 = vpack.c.bf16 %v1296_v23, %v1296_v23  ;;  %v1305_v28 = vadd.f32 %v2003_v25, %v2167_v0 }
 0x155   :  { %v664_v54 = vpop.f32.mrf.mxu0  ;;  %v886_v30 = vpop.f32.mrf.mxu1 }
 0x156   :  { %v1850_v56 = vpack.c.bf16 %v1262_v51, %v1261_v50  ;;  %v1264_v61 = vadd.f32 %v2157_v45, %v664_v54  ;;  %1687 = vst [vmem:[#allocation8 + $0x128] sm:$0xf] %v1873_v27  ;;  %v1879_v33 = vpack.c.bf16 %v1305_v28, %v1305_v28  ;;  %v1299_v34 = vadd.f32 %v2167_v0, %v886_v30 }
 0x157   :  { %v666_v59 = vpop.f32.mrf.mxu0  ;;  %v2006_v36 = vpop.f32.mrf.mxu1 }
 0x158   :  { %1664 = vst [vmem:[#allocation8 + $0x9c] sm:$0xff] %v1850_v56  ;;  %v1265_v62 = vadd.f32 %v2159_v46, %v666_v59  ;;  %1693 = vst [vmem:[#allocation8 + $0x14c] sm:$0xf] %v1879_v33  ;;  %v1875_v38 = vpack.c.bf16 %v1299_v34, %v1299_v34  ;;  %v1314_v39 = vadd.f32 %v2006_v36, %v2167_v0 }
 0x159   :  { %v668_v2 = vpop.f32.mrf.mxu0  ;;  %v899_v41 = vpop.f32.mrf.mxu1 }
 0x15a   :  { %v1852_v4 = vpack.c.bf16 %v1265_v62, %v1264_v61  ;;  %v1267_v9 = vadd.f32 %v2157_v45, %v668_v2  ;;  %1689 = vst [vmem:[#allocation8 + $0x134] sm:$0xf] %v1875_v38  ;;  %v1885_v44 = vpack.c.bf16 %v1314_v39, %v1314_v39  ;;  %v1308_v47 = vadd.f32 %v2167_v0, %v899_v41 }
 0x15b   :  { %v670_v7 = vpop.f32.mrf.mxu0  ;;  %v2007_v49 = vpop.f32.mrf.mxu1 }
 0x15c   :  { %1666 = vst [vmem:[#allocation8 + $0xa8] sm:$0xff] %v1852_v4  ;;  %v1268_v10 = vadd.f32 %v2159_v46, %v670_v7  ;;  %1699 = vst [vmem:[#allocation8 + $0x170] sm:$0xf] %v1885_v44  ;;  %v1881_v51 = vpack.c.bf16 %v1308_v47, %v1308_v47  ;;  %v1317_v52 = vadd.f32 %v2007_v49, %v2167_v0 }
 0x15d   :  { %v674_v13 = vpop.f32.mrf.mxu0  ;;  %v902_v54 = vpop.f32.mrf.mxu1 }
 0x15e   :  { %v1854_v15 = vpack.c.bf16 %v1268_v10, %v1267_v9  ;;  %v1270_v20 = vadd.f32 %v2157_v45, %v674_v13  ;;  %1695 = vst [vmem:[#allocation8 + $0x158] sm:$0xf] %v1881_v51  ;;  %v1887_v57 = vpack.c.bf16 %v1317_v52, %v1317_v52  ;;  %v1311_v58 = vadd.f32 %v2167_v0, %v902_v54 }
 0x15f   :  { %v676_v18 = vpop.f32.mrf.mxu0 }
 0x160   :  { %1668 = vst [vmem:[#allocation8 + $0xb4] sm:$0xff] %v1854_v15  ;;  %v1271_v21 = vadd.f32 %v2159_v46, %v676_v18  ;;  %1701 = vst [vmem:[#allocation8 + $0x17c] sm:$0xf] %v1887_v57  ;;  %v1883_v61 = vpack.c.bf16 %v1311_v58, %v1311_v58 }
 0x161   :  { %v678_v24 = vpop.f32.mrf.mxu0 }
 0x162   :  { %v1856_v26 = vpack.c.bf16 %v1271_v21, %v1270_v20  ;;  %v1273_v31 = vadd.f32 %v2157_v45, %v678_v24  ;;  %1697 = vst [vmem:[#allocation8 + $0x164] sm:$0xf] %v1883_v61 }
 0x163   :  { %v680_v29 = vpop.f32.mrf.mxu0 }
 0x164   :  { %1670 = vst [vmem:[#allocation8 + $0xc0] sm:$0xff] %v1856_v26  ;;  %v1274_v32 = vadd.f32 %v2159_v46, %v680_v29 }
 0x165   :  { %v684_v35 = vpop.f32.mrf.mxu0 }
 0x166   :  { %v1858_v37 = vpack.c.bf16 %v1274_v32, %v1273_v31  ;;  %v1276_v42 = vadd.f32 %v2157_v45, %v684_v35 }
 0x167   :  { %v686_v40 = vpop.f32.mrf.mxu0 }
 0x168   :  { %1672 = vst [vmem:[#allocation8 + $0xcc] sm:$0xff] %v1858_v37  ;;  %v1277_v43 = vadd.f32 %v2159_v46, %v686_v40 }
 0x169   :  { %v688_v48 = vpop.f32.mrf.mxu0 }
 0x16a   :  { %v1860_v50 = vpack.c.bf16 %v1277_v43, %v1276_v42  ;;  %v1279_v55 = vadd.f32 %v2157_v45, %v688_v48 }
 0x16b   :  { %v690_v53 = vpop.f32.mrf.mxu0 }
 0x16c   :  { %1674 = vst [vmem:[#allocation8 + $0xd8] sm:$0xff] %v1860_v50  ;;  %v1280_v56 = vadd.f32 %v2159_v46, %v690_v53 }
 0x16d   :  { %v694_v59 = vpop.f32.mrf.mxu0 }
 0x16e   :  { %v1862_v60 = vpack.c.bf16 %v1280_v56, %v1279_v55  ;;  %v1282_v63 = vadd.f32 %v2157_v45, %v694_v59 }
 0x16f   :  { %v696_v62 = vpop.f32.mrf.mxu0 }
 0x170   :  { %1676 = vst [vmem:[#allocation8 + $0xe4] sm:$0xff] %v1862_v60  ;;  %v1283_v1 = vadd.f32 %v2159_v46, %v696_v62 }
 0x171   :  { %v698_v2 = vpop.f32.mrf.mxu0 }
 0x172   :  { %v1864_v3 = vpack.c.bf16 %v1283_v1, %v1282_v63  ;;  %v1285_v5 = vadd.f32 %v2157_v45, %v698_v2 }
 0x173   :  { %v700_v4 = vpop.f32.mrf.mxu0 }
 0x174   :  { %1678 = vst [vmem:[#allocation8 + $0xf0] sm:$0xff] %v1864_v3  ;;  %v1286_v6 = vadd.f32 %v2159_v46, %v700_v4 }
 0x175   :  { %v704_v0 = vpop.f32.mrf.mxu0 }
 0x176   :  { %v1866_v7 = vpack.c.bf16 %v1286_v6, %v1285_v5  ;;  %v1288_v9 = vadd.f32 %v2157_v45, %v704_v0 }
 0x177   :  { %v706_v8 = vpop.f32.mrf.mxu0 }
 0x178   :  { %1680 = vst [vmem:[#allocation8 + $0xfc] sm:$0xff] %v1866_v7  ;;  %v1289_v10 = vadd.f32 %v2159_v46, %v706_v8 }
 0x179   :  { %v708_v11 = vpop.f32.mrf.mxu0 }
 0x17a   :  { %v1868_v12 = vpack.c.bf16 %v1289_v10, %v1288_v9  ;;  %v1291_v14 = vadd.f32 %v2157_v45, %v708_v11 }
 0x17b   :  { %v710_v13 = vpop.f32.mrf.mxu0 }
 0x17c   :  { %1682 = vst [vmem:[#allocation8 + $0x108] sm:$0xff] %v1868_v12  ;;  %v1292_v15 = vadd.f32 %v2159_v46, %v710_v13 }
 0x17d   :  { %v714_v16 = vpop.f32.mrf.mxu0 }
 0x17e   :  { %v1870_v17 = vpack.c.bf16 %v1292_v15, %v1291_v14  ;;  %v1294_v19 = vadd.f32 %v2157_v45, %v714_v16 }
 0x17f   :  { %v716_v18 = vpop.f32.mrf.mxu0 }
 0x180   :  { %1684 = vst [vmem:[#allocation8 + $0x114] sm:$0xff] %v1870_v17  ;;  %v1295_v20 = vadd.f32 %v2159_v46, %v716_v18 }
 0x181   :  { %v718_v21 = vpop.f32.mrf.mxu0 }
 0x182   :  { %v1872_v22 = vpack.c.bf16 %v1295_v20, %v1294_v19  ;;  %v1297_v24 = vadd.f32 %v2157_v45, %v718_v21 }
 0x183   :  { %v720_v23 = vpop.f32.mrf.mxu0 }
 0x184   :  { %1686 = vst [vmem:[#allocation8 + $0x120] sm:$0xff] %v1872_v22  ;;  %v1298_v25 = vadd.f32 %v2159_v46, %v720_v23 }
 0x185   :  { %v724_v26 = vpop.f32.mrf.mxu0 }
 0x186   :  { %v1874_v27 = vpack.c.bf16 %v1298_v25, %v1297_v24  ;;  %v1300_v29 = vadd.f32 %v2157_v45, %v724_v26 }
 0x187   :  { %v726_v28 = vpop.f32.mrf.mxu0 }
 0x188   :  { %1688 = vst [vmem:[#allocation8 + $0x12c] sm:$0xff] %v1874_v27  ;;  %v1301_v30 = vadd.f32 %v2159_v46, %v726_v28 }
 0x189   :  { %v728_v31 = vpop.f32.mrf.mxu0 }
 0x18a   :  { %v1876_v32 = vpack.c.bf16 %v1301_v30, %v1300_v29  ;;  %v1303_v34 = vadd.f32 %v2157_v45, %v728_v31 }
 0x18b   :  { %v730_v33 = vpop.f32.mrf.mxu0 }
 0x18c   :  { %1690 = vst [vmem:[#allocation8 + $0x138] sm:$0xff] %v1876_v32  ;;  %v1304_v35 = vadd.f32 %v2159_v46, %v730_v33 }
 0x18d   :  { %v734_v36 = vpop.f32.mrf.mxu0 }
 0x18e   :  { %v1878_v37 = vpack.c.bf16 %v1304_v35, %v1303_v34  ;;  %v1306_v39 = vadd.f32 %v2157_v45, %v734_v36 }
 0x18f   :  { %v736_v38 = vpop.f32.mrf.mxu0 }
 0x190   :  { %1692 = vst [vmem:[#allocation8 + $0x144] sm:$0xff] %v1878_v37  ;;  %v1307_v40 = vadd.f32 %v2159_v46, %v736_v38 }
 0x191   :  { %v738_v41 = vpop.f32.mrf.mxu0 }
 0x192   :  { %v1880_v42 = vpack.c.bf16 %v1307_v40, %v1306_v39  ;;  %v1309_v44 = vadd.f32 %v2157_v45, %v738_v41 }
 0x193   :  { %v740_v43 = vpop.f32.mrf.mxu0 }
 0x194   :  { %1694 = vst [vmem:[#allocation8 + $0x150] sm:$0xff] %v1880_v42  ;;  %v1310_v47 = vadd.f32 %v2159_v46, %v740_v43 }
 0x195   :  { %v744_v48 = vpop.f32.mrf.mxu0 }
 0x196   :  { %v1882_v49 = vpack.c.bf16 %v1310_v47, %v1309_v44  ;;  %v1312_v51 = vadd.f32 %v2157_v45, %v744_v48 }
 0x197   :  { %v746_v50 = vpop.f32.mrf.mxu0 }
 0x198   :  { %1696 = vst [vmem:[#allocation8 + $0x15c] sm:$0xff] %v1882_v49  ;;  %v1313_v52 = vadd.f32 %v2159_v46, %v746_v50 }
 0x199   :  { %v748_v53 = vpop.f32.mrf.mxu0 }
 0x19a   :  { %v1884_v54 = vpack.c.bf16 %v1313_v52, %v1312_v51  ;;  %v1315_v56 = vadd.f32 %v2157_v45, %v748_v53 }
 0x19b   :  { %v750_v55 = vpop.f32.mrf.mxu0 }
 0x19c   :  { %1698 = vst [vmem:[#allocation8 + $0x168] sm:$0xff] %v1884_v54  ;;  %v1316_v57 = vadd.f32 %v2159_v46, %v750_v55 }
 0x19e   :  { %v1886_v58 = vpack.c.bf16 %v1316_v57, %v1315_v56 }
 0x1a0   :  { %1700 = vst [vmem:[#allocation8 + $0x174] sm:$0xff] %v1886_v58 }
 0x1a1   :  { %2106 = shalt.err (!%p2103_p0)
}
 0x1a2   :  { %s2126_s26 = smov 192   ;;  %s2127_s27 = smov 12  }
 0x1a3   :  { %1713 = dma.vmem_to_hbm [thread:$0]  %s1708_s24, 6144, %s2265_s3, [#allocation5], %s2126_s26, %s2126_s26, %s2127_s27  }
 0x1a4   :  { %2119 = dma.done.wait [#allocation5], 6144  }
 0x1a5   :  { %2120 = vsyncadd [#allocation5], 4294961152 }
 0x1a6   :  { %1717 = vsyncpa [#allocation4], 1 }
 0x1a7   :  { %1718 = vsyncpa [#allocation7], 1 }
 0x1a8   :  { %1719 = vsyncpa [#allocation5], 1 }

</bundles_post_ra>
